<compile_context>
chip_gen: v5e
topology: v5e:2x2
jax: 0.10.0
libtpu: 0.0.40
codegen_flags: <defaults>
</compile_context>

<pallas_src>
import math
import functools

import jax
import jax.numpy as jnp
from jax.experimental import pallas as pl
from jax.experimental.pallas import tpu as pltpu


# ------------------------- hardware-aware sizing helpers -------------------------

def _vmem_capacity_bytes():
    try:
        return int(pltpu.get_tpu_info().vmem_capacity_bytes)
    except Exception:
        return 64 << 20  # conservative default (v7x per-TensorCore VMEM)


def _scoped_vmem_limit(cap):
    # Leave headroom for compiler-internal scratch and double buffers:
    #   v7x (64 MiB physical)  -> 48 MiB ;  v5e/v6e (128 MiB) -> 96 MiB.
    return int(min((cap * 3) // 4, 100 << 20))


def _pick_tile(dim, pref, align):
    """Largest tile <= pref that divides `dim` and is a multiple of `align`.

    Falls back to 8-alignment, then to the full dimension (which always satisfies the
    TPU last-two-dims tiling rule).  The full-dim fallback asserts a sanity cap so an
    awkward size fails loudly instead of silently blowing VMEM.
    """
    if dim <= pref:
        return dim
    for a in (align, 8):
        t = (pref // a) * a
        while t >= a:
            if dim % t == 0:
                return t
            t -= a
    assert dim <= 4096, (
        f"_pick_tile: no aligned tile divides {dim}; pad the dimension to a multiple "
        f"of {align} instead of using a {dim}-wide block")
    return dim


def _largest_divisor_leq(n, cap):
    for c in range(min(n, cap), 0, -1):
        if n % c == 0:
            return c
    return 1


# ------------------------------ linear kernels ------------------------------

def _linear_kernel_f32(x_ref, w_ref, b_ref, o_ref):
    # f32 output: accumulate directly into the resident output block (no scratch, no copy).
    @pl.when(pl.program_id(2) == 0)
    def _():
        o_ref[...] = jnp.broadcast_to(b_ref[...], o_ref.shape).astype(o_ref.dtype)

    o_ref[...] += jnp.dot(x_ref[...], w_ref[...], preferred_element_type=jnp.float32)


def _linear_kernel_acc(x_ref, w_ref, b_ref, o_ref, acc_ref):
    # sub-f32 output: f32 accumulator scratch, cast once at the last k step.
    @pl.when(pl.program_id(2) == 0)
    def _():
        acc_ref[...] = jnp.broadcast_to(b_ref[...].astype(jnp.float32), acc_ref.shape)

    acc_ref[...] += jnp.dot(x_ref[...], w_ref[...], preferred_element_type=jnp.float32)

    @pl.when(pl.program_id(2) == pl.num_programs(2) - 1)
    def _():
        o_ref[...] = acc_ref[...].astype(o_ref.dtype)


def linear(x2d, wT, bias):
    # x2d: [M, K], wT: [K, N] (pre-transposed at init), bias: [N]
    M, K = x2d.shape
    _, N = wT.shape
    tm = _pick_tile(M, 256, 128)   # 128-aligned M tiles feed the full MXU
    tn = _pick_tile(N, 256, 128)
    tk = _pick_tile(K, 512, 128)
    grid = (M // tm, N // tn, K // tk)
    out_dtype = x2d.dtype
    f32_out = (out_dtype == jnp.float32)
    kernel = _linear_kernel_f32 if f32_out else _linear_kernel_acc
    scratch = [] if f32_out else [pltpu.VMEM((tm, tn), jnp.float32)]
    cap = _vmem_capacity_bytes()
    return pl.pallas_call(
        kernel,
        out_shape=jax.ShapeDtypeStruct((M, N), out_dtype),
        grid_spec=pltpu.PrefetchScalarGridSpec(
            num_scalar_prefetch=0,
            grid=grid,
            in_specs=[
                pl.BlockSpec((tm, tk), lambda i, j, k: (i, k)),
                pl.BlockSpec((tk, tn), lambda i, j, k: (k, j)),
                pl.BlockSpec((1, tn), lambda i, j, k: (0, j)),
            ],
            out_specs=pl.BlockSpec((tm, tn), lambda i, j, k: (i, j)),
            scratch_shapes=scratch,
        ),
        compiler_params=pltpu.CompilerParams(
            dimension_semantics=("parallel", "parallel", "arbitrary"),
            vmem_limit_bytes=_scoped_vmem_limit(cap),
        ),
    )(x2d, wT, bias.reshape(1, N).astype(out_dtype))


# ----------------------------- attention kernel -----------------------------

def _attn_kernel(inv_norm, q_ref, k_ref, v_ref, m_ref, o_ref,
                 q_sc, m_sc, l_sc, acc_sc):
    # Per grid step (bi, hi, qi, ki):
    #   q: [1, hb, tq, d], k/v: [1, hb, tk, d], mask: [1, tq, tk] (shared over heads).
    ki = pl.program_id(3)

    @pl.when(ki == 0)
    def _():
        # Finite floor instead of -inf: a fully masked kv tile cannot create NaN.
        m_sc[...] = jnp.full(m_sc.shape, -1e30, jnp.float32)
        l_sc[...] = jnp.zeros(l_sc.shape, jnp.float32)
        acc_sc[...] = jnp.zeros(acc_sc.shape, jnp.float32)
        # Hoist the 1/norm_factor Q scaling out of the kv reduction loop (once per q tile).
        q_sc[...] = (q_ref[0] * inv_norm).astype(q_sc.dtype)

    q = q_sc[...]                        # [hb, tq, d]  native dtype, pre-scaled
    k = k_ref[0]                         # [hb, tk, d]  native dtype (bf16 MXU path if bf16)
    v = v_ref[0]                         # [hb, tk, d]
    mask = m_ref[0].astype(jnp.float32)  # [tq, tk]

    # Batched QK^T over this head tile; f32 accumulation via preferred_element_type.
    s_ = jnp.einsum('hqd,hkd->hqk', q, k,
                    preferred_element_type=jnp.float32) + mask[None]

    # Online (flash-style) softmax statistics in f32 scratch.
    m_new = jnp.maximum(m_sc[...], s_.max(axis=-1, keepdims=True))
    alpha = jnp.exp(m_sc[...] - m_new)
    p = jnp.exp(s_ - m_new)
    l_sc[...] = alpha * l_sc[...] + p.sum(axis=-1, keepdims=True)
    acc_sc[...] = alpha * acc_sc[...] + jnp.einsum(
        'hqk,hkd->hqd', p.astype(v.dtype), v, preferred_element_type=jnp.float32)
    m_sc[...] = m_new

    @pl.when(ki == pl.num_programs(3) - 1)
    def _():
        inv_l = pl.reciprocal(l_sc[...], approx=True)
        o_ref[0] = (acc_sc[...] * inv_l).astype(o_ref.dtype)


def attention(q, k, v, mask, norm_factor):
    # q, k, v: [b, nh, s, d]; mask: [mb, s, s] with mb in {1, b} -> ctx: [b, nh, s, d]
    b, nh, s, d = q.shape
    mb = mask.shape[0]
    cap = _vmem_capacity_bytes()
    big_vmem = cap >= (96 << 20)                # v5e / v6e (128 MiB) vs v7x (64 MiB)
    tq = _pick_tile(s, 512 if big_vmem else 256, 128)
    tk = _pick_tile(s, 512 if big_vmem else 256, 128)
    hb = _largest_divisor_leq(nh, 8)            # VMEM footprint independent of head count
    grid = (b, nh // hb, s // tq, s // tk)

    if mb == 1:   # batch-shared mask: one [s, s] slab, never duplicated per batch element
        mask_map = lambda bi, hi, qi, ki: (0, qi, ki)
    else:
        mask_map = lambda bi, hi, qi, ki: (bi, qi, ki)

    # TODO(synk): for causal / statically-known masks, generate the mask in-kernel with
    # broadcasted_iota and skip fully-masked kv tiles instead of DMA-ing a mask block.
    kern = functools.partial(_attn_kernel, 1.0 / norm_factor)
    return pl.pallas_call(
        kern,
        out_shape=jax.ShapeDtypeStruct((b, nh, s, d), q.dtype),
        grid_spec=pltpu.PrefetchScalarGridSpec(
            num_scalar_prefetch=0,
            grid=grid,
            in_specs=[
                pl.BlockSpec((1, hb, tq, d), lambda bi, hi, qi, ki: (bi, hi, qi, 0)),
                pl.BlockSpec((1, hb, tk, d), lambda bi, hi, qi, ki: (bi, hi, ki, 0)),
                pl.BlockSpec((1, hb, tk, d), lambda bi, hi, qi, ki: (bi, hi, ki, 0)),
                pl.BlockSpec((1, tq, tk), mask_map),
            ],
            out_specs=pl.BlockSpec((1, hb, tq, d), lambda bi, hi, qi, ki: (bi, hi, qi, 0)),
            scratch_shapes=[
                pltpu.VMEM((hb, tq, d), q.dtype),       # pre-scaled Q (hoisted)
                pltpu.VMEM((hb, tq, 1), jnp.float32),   # running max
                pltpu.VMEM((hb, tq, 1), jnp.float32),   # running denom
                pltpu.VMEM((hb, tq, d), jnp.float32),   # f32 output accumulator
            ],
        ),
        compiler_params=pltpu.CompilerParams(
            dimension_semantics=("parallel", "parallel", "parallel", "arbitrary"),
            vmem_limit_bytes=_scoped_vmem_limit(cap),
        ),
    )(q, k, v, mask)


# ------------------------------ Module wrapper ------------------------------

class TransformerSelfAttentionRing:
    def __init__(self, hidden_size, kv_channels, num_attention_heads,
                 attention_dropout, key):
        self.hidden_size = hidden_size
        self.num_attention_heads = num_attention_heads
        projection_size = kv_channels * num_attention_heads
        self.projection_size = projection_size
        self.hidden_size_per_attention_head = projection_size // num_attention_heads
        self.world_size = 1  # single device: ring attention == local attention
        self.norm_factor = math.sqrt(hidden_size)  # matches the ColossalAI module
        # TODO(synk): attention_dropout is treated as identity (inference / p=0.0)

        k1, k2, k3, k4 = jax.random.split(key, 4)
        # torch nn.Linear default init: U(-1/sqrt(fan_in), 1/sqrt(fan_in)).
        # Weights are stored pre-transposed as [K, N] so kernels do x @ w directly.
        # (For production on v6e/v7x store these in bf16; kept f32 here for exact parity.)
        b1 = 1.0 / math.sqrt(hidden_size)
        self.qkv_wT = jax.random.uniform(k1, (hidden_size, 3 * projection_size),
                                         minval=-b1, maxval=b1, dtype=jnp.float32)
        self.qkv_b = jax.random.uniform(k2, (3 * projection_size,),
                                        minval=-b1, maxval=b1, dtype=jnp.float32)
        b2 = 1.0 / math.sqrt(projection_size)
        self.dense_wT = jax.random.uniform(k3, (projection_size, hidden_size),
                                           minval=-b2, maxval=b2, dtype=jnp.float32)
        self.dense_b = jax.random.uniform(k4, (hidden_size,),
                                          minval=-b2, maxval=b2, dtype=jnp.float32)

    def __call__(self, hidden_states, attention_mask):
        s, b, h = hidden_states.shape
        nh = self.num_attention_heads
        d = self.hidden_size_per_attention_head

        # QKV projection (tiled Pallas matmul)
        x2d = hidden_states.reshape(s * b, h)
        mixed = linear(x2d, self.qkv_wT, self.qkv_b)           # [s*b, 3*proj]

        # [s*b, 3*proj] -> [s, b, nh, 3, d] -> one transpose -> [3, b, nh, s, d]
        # TODO(synk): folding this transpose into the qkv out_specs / attention in_specs
        # needs non-rectangular blocks (s-major/b-minor rows), so it stays in XLA.
        mixed = mixed.reshape(s, b, nh, 3, d)
        qkv = jnp.transpose(mixed, (3, 1, 2, 0, 4))
        q, k, v = qkv[0], qkv[1], qkv[2]                       # each [b, nh, s, d]

        # Deduplicate the additive mask: [mb, s, s] with mb in {1, b}; head axis never
        # materialized (the module broadcasts the mask over heads anyway).
        am = jnp.asarray(attention_mask, dtype=jnp.float32)
        if am.shape[-2:] != (s, s):
            raise ValueError("attention_mask last two dims must be (s, s)")
        mb = am.shape[0] if am.ndim > 2 else 1
        if mb not in (1, b):
            raise ValueError("attention_mask leading dim must be 1 or batch_size")
        mask = am.reshape(mb, -1, s, s)
        if mask.shape[1] != 1:
            # TODO(synk): per-head masks would need a per-head mask BlockSpec.
            raise NotImplementedError("per-head attention masks are not supported")
        mask = mask[:, 0]                                      # [mb, s, s]

        # Fused flash-style scores/softmax/AV (Pallas kernel), head-tiled grid.
        ctx = attention(q, k, v, mask, self.norm_factor)       # [b, nh, s, d]

        # [b, nh, s, d] -> permute(2,0,1,3) -> [s, b, nh*d]  (matches torch)
        # TODO(synk): could be folded into the dense in_spec with an (s, b) M-grid.
        ctx = ctx.transpose(2, 0, 1, 3).reshape(s * b, nh * d)

        # output dense (tiled Pallas matmul)
        out = linear(ctx, self.dense_wT, self.dense_b)
        out = out.reshape(s, b, self.hidden_size)
        return out, self.dense_b


# ----------------------------- reference (pure JAX) -----------------------------

def reference_forward(mod, hidden_states, attention_mask):
    s, b, h = hidden_states.shape
    nh = mod.num_attention_heads
    d = mod.hidden_size_per_attention_head
    mixed = hidden_states.reshape(s * b, h) @ mod.qkv_wT + mod.qkv_b
    mixed = mixed.reshape(s, b, nh, 3 * d)
    q, k, v = jnp.split(mixed, 3, axis=-1)                     # each [s, b, nh, d]
    q = q.transpose(1, 2, 0, 3)                                # [b, nh, s, d]
    k = k.transpose(1, 2, 0, 3)
    v = v.transpose(1, 2, 0, 3)
    scores = jnp.einsum('bhqd,bhkd->bhqk', q, k) / mod.norm_factor
    scores = scores[:, None] + attention_mask                  # [b, 1, nh, s, s]
    probs = jax.nn.softmax(scores, axis=-1)[:, 0]              # [b, nh, s, s]
    ctx = jnp.einsum('bhqk,bhkd->bhqd', probs, v)              # [b, nh, s, d]
    ctx = ctx.transpose(2, 0, 1, 3).reshape(s * b, nh * d)
    out = ctx @ mod.dense_wT + mod.dense_b
    return out.reshape(s, b, h), mod.dense_b


# ----------------------------------- main -----------------------------------

if __name__ == "__main__":
    seq, batch, hidden = 8, 2, 32
    kv_channels, num_heads = 8, 4

    key = jax.random.PRNGKey(0)
    k_in, k_params = jax.random.split(key)

    hidden_states = jax.random.normal(k_in, (seq, batch, hidden), dtype=jnp.float32)
    # additive attention mask (causal), batch-shared: [1, 1, 1, s, s]
    causal = jnp.tril(jnp.ones((seq, seq), dtype=jnp.float32))
    attention_mask = jnp.where(causal > 0, 0.0, -1e4)[None, None, None, :, :]

    module = TransformerSelfAttentionRing(hidden_size=hidden,
                                          kv_channels=kv_channels,
                                          num_attention_heads=num_heads,
                                          attention_dropout=0.0,
                                          key=k_params)

    out, bias = module(hidden_states, attention_mask)
    out = jax.block_until_ready(out)
    bias = jax.block_until_ready(bias)

    ref_out, ref_bias = reference_forward(module, hidden_states, attention_mask)
    assert out.shape == (seq, batch, hidden)
    # slightly looser tolerance: approx reciprocal (EUP) + online-softmax accumulation order
    assert jnp.allclose(out, ref_out, atol=2e-3, rtol=2e-3), \
        f"max abs err = {jnp.max(jnp.abs(out - ref_out))}"
    assert jnp.allclose(bias, ref_bias)

    print("KERNEL_OK")
</pallas_src>

<mosaic_0001>
module attributes {stable_mosaic.version = 11 : i64} {
  func.func @_linear_kernel_f32(%arg0: i32, %arg1: i32, %arg2: i32, %arg3: memref<16x32xf32, #tpu.memory_space<vmem>>, %arg4: memref<32x96xf32, #tpu.memory_space<vmem>>, %arg5: memref<1x96xf32, #tpu.memory_space<vmem>>, %arg6: memref<16x96xf32, #tpu.memory_space<vmem>>) attributes {dimension_semantics = [#tpu.dimension_semantics<parallel>, #tpu.dimension_semantics<parallel>, #tpu.dimension_semantics<arbitrary>], iteration_bounds = array<i64: 1, 1, 1>, scalar_prefetch = 0 : i64, scratch_operands = 0 : i64, tpu.core_type = #tpu.core_type<tc>, window_params = [{transform_indices = @transform_0, window_bounds = array<i64: 16, 32>}, {transform_indices = @transform_1, window_bounds = array<i64: 32, 96>}, {transform_indices = @transform_2, window_bounds = array<i64: 1, 96>}, {transform_indices = @transform_3, window_bounds = array<i64: 16, 96>}]} {
    %c0_i32 = arith.constant 0 : i32
    %0 = arith.cmpi eq, %arg2, %c0_i32 : i32
    %1 = arith.extui %0 : i1 to i32
    %c0_i32_0 = arith.constant 0 : i32
    %2 = arith.cmpi ne, %1, %c0_i32_0 : i32
    scf.if %2 {
      %c0_8 = arith.constant 0 : index
      %c0_9 = arith.constant 0 : index
      %9 = vector.load %arg5[%c0_8, %c0_9] : memref<1x96xf32, #tpu.memory_space<vmem>>, vector<1x96xf32>
      %10 = vector.shape_cast %9 : vector<1x96xf32> to vector<1x96xf32>
      %11 = vector.broadcast %10 : vector<1x96xf32> to vector<16x96xf32>
      %c0_10 = arith.constant 0 : index
      %c0_11 = arith.constant 0 : index
      %12 = vector.load %arg6[%c0_10, %c0_11] : memref<16x96xf32, #tpu.memory_space<vmem>>, vector<16x96xf32>
      tpu.vector_store %arg6[%c0_10, %c0_11], %11 {strides = array<i32>} : memref<16x96xf32, #tpu.memory_space<vmem>>, vector<16x96xf32>,
    } else {
    }
    %c0 = arith.constant 0 : index
    %c0_1 = arith.constant 0 : index
    %3 = vector.load %arg6[%c0, %c0_1] : memref<16x96xf32, #tpu.memory_space<vmem>>, vector<16x96xf32>
    %c0_2 = arith.constant 0 : index
    %c0_3 = arith.constant 0 : index
    %4 = vector.load %arg3[%c0_2, %c0_3] : memref<16x32xf32, #tpu.memory_space<vmem>>, vector<16x32xf32>
    %c0_4 = arith.constant 0 : index
    %c0_5 = arith.constant 0 : index
    %5 = vector.load %arg4[%c0_4, %c0_5] : memref<32x96xf32, #tpu.memory_space<vmem>>, vector<32x96xf32>
    %cst = arith.constant dense<0.000000e+00> : vector<16x96xf32>
    %6 = tpu.matmul %4, %5, %cst {dimension_numbers = #tpu.dot_dimension_numbers<[1], [0], [0], [1], [0, 0, 1, 1], [], []>} : vector<16x32xf32>, vector<32x96xf32>, vector<16x96xf32> -> vector<16x96xf32>
    %7 = arith.addf %3, %6 : vector<16x96xf32>
    %c0_6 = arith.constant 0 : index
    %c0_7 = arith.constant 0 : index
    %8 = vector.load %arg6[%c0_6, %c0_7] : memref<16x96xf32, #tpu.memory_space<vmem>>, vector<16x96xf32>
    tpu.vector_store %arg6[%c0_6, %c0_7], %7 {strides = array<i32>} : memref<16x96xf32, #tpu.memory_space<vmem>>, vector<16x96xf32>,
    return
  }
  func.func @transform_0(%arg0: i32, %arg1: i32, %arg2: i32) -> (i32, i32) {
    %c0_i32 = arith.constant 0 : i32
    return %arg0, %arg2 : i32, i32
  }
  func.func @transform_1(%arg0: i32, %arg1: i32, %arg2: i32) -> (i32, i32) {
    %c0_i32 = arith.constant 0 : i32
    return %arg2, %arg1 : i32, i32
  }
  func.func @transform_2(%arg0: i32, %arg1: i32, %arg2: i32) -> (i32, i32) {
    %c0_i32 = arith.constant 0 : i32
    %c0_i32_0 = arith.constant 0 : i32
    return %c0_i32, %arg1 : i32, i32
  }
  func.func @transform_3(%arg0: i32, %arg1: i32, %arg2: i32) -> (i32, i32) {
    %c0_i32 = arith.constant 0 : i32
    return %arg0, %arg1 : i32, i32
  }
}

</mosaic_0001>

<bundles_post_ra>
// kernel: tpu_custom_call.1
= control target key start
LH: loop header
LB: loop body
LE: loop exit
PB: predicated region body
PF: predicated region fallthrough
CT: control target
= control target key end

     0   :  { %8 = vsyncpa [#allocation3], 0  ;;  %s261_s0 = inlined_call_operand.hbm [shape: f32[16,32], index: 0, kind: input, shape index: {}]   ;;  %s262_s1 = inlined_call_operand.hbm [shape: f32[32,96], index: 1, kind: input, shape index: {}]   ;;  %s263_s2 = inlined_call_operand.vmem [shape: f32[1,96], index: 2, kind: input, shape index: {}]   ;;  %s264_s3 = inlined_call_operand.hbm [shape: f32[16,96], index: 3, kind: output, shape index: {}]  }
   0x1   :  { %9 = vsyncpa [#allocation6], 0 }
   0x2   :  { %10 = vsyncpa [#allocation4], 0  ;;  %s15_s14 = sshll.u32 %s261_s0, 4  ;;  %s211_s15 = smov [#allocation2]   ;;  %s16_s14 = int_to_ptr.hbm [resolvable:$true] %s15_s14 }
   0x3   :  { %s17_s16 = sshll.u32 %s211_s15, 4  ;;  %s28_s19 = sshll.u32 %s262_s1, 4  ;;  %s18_s16 = int_to_ptr.vmem [resolvable:$true] %s17_s16  ;;  %s29_s19 = int_to_ptr.hbm [resolvable:$true] %s28_s19 }
   0x4   :  { %s212_s20 = smov 128   ;;  %s213_s21 = smov 8  }
   0x5   :  { %23 = dma.hbm_to_vmem [thread:$0]  %s16_s14, 256, %s18_s16, [#allocation3], %s212_s20, %s212_s20, %s213_s21  }
   0x6   :  { %s214_s22 = smov [#allocation5]  }
   0x7   :  { %s30_s23 = sshll.u32 %s214_s22, 4  ;;  %s31_s23 = int_to_ptr.vmem [resolvable:$true] %s30_s23 }
   0x8   :  { %36 = dma.hbm_to_vmem [thread:$0]  %s29_s19, 512, %s31_s23, [#allocation6], %s212_s20, %s212_s20, %s213_s21  }
   0x9   :  { %205 = dma.done.wait [#allocation3], 256  }
   0xa   :  { %206 = vsyncadd [#allocation3], 4294967040 }
   0xb   :  { %207 = dma.done.wait [#allocation6], 512  }
   0xc   :  { %208 = vsyncadd [#allocation6], 4294966784  ;;  %v65_v0 = vld [vmem:[#allocation5 + $0x18] sm:$0xff]  ;;  %v64_v1 = vld [vmem:[#allocation5 + $0x10] sm:$0xff]  ;;  %vm55_vm0 = vcmask 785408   ;;  %vm66_vm1 = vcmask 261120  }
   0xd   :  { %85 = vmatpush.msra.mxu0 %v65_v0  ;;  %123 = vmatpush.msra.mxu1 %v65_v0  ;;  %v63_v2 = vld [vmem:[#allocation5 + $0x8] sm:$0xff]  ;;  %v132_v3 = vld [vmem:[%s263_s2] ss:$0 sm:$0xff]  ;;  %v62_v4 = vld [vmem:[#allocation5] sm:$0xff]  ;;  %s215_s24 = smov [#allocation7]   ;;  %s107_s27 = sshll.u32 %s264_s3, 4  ;;  %s108_s27 = int_to_ptr.hbm [resolvable:$true] %s107_s27 }
   0xe   :  { %56 = vst.msk [vmem:[#allocation7] sm:$0xff] %vm55_vm0, %v132_v3  ;;  %v60_v5 = vld [vmem:[#allocation2] sm:$0xff]  ;;  %v61_v6 = vld [vmem:[#allocation2 + $0x8] sm:$0xff]  ;;  %s105_s2 = sshll.u32 %s215_s24, 4  ;;  %s106_s2 = int_to_ptr.vmem [resolvable:$true] %s105_s2 }
   0xf   :  { %86 = vmatpush.msra.mxu0 %v64_v1  ;;  %124 = vmatpush.msra.mxu1 %v64_v1  ;;  %57 = vst.msk [vmem:[#allocation7 + $0x8] sm:$0xff] %vm55_vm0, %v132_v3 }
  0x11   :  { %87 = vmatpush.msra.mxu0 %v63_v2  ;;  %125 = vmatpush.msra.mxu1 %v63_v2 }
  0x13   :  { %88 = vmatpush.msra.mxu0 %v62_v4  ;;  %126 = vmatpush.msra.mxu1 %v62_v4 }
  0x14   :  { %121 = vmatmul.msk.f32.vlgmr.msra.gmra.mxu0 %vm66_vm1, %v60_v5  ;;  %122 = vmatmul.msk.f32.vlgmr.msra.gmra.mxu1 %vm66_vm1, %v61_v6 }
  0x15   :  { %v58_v7 = vld [vmem:[#allocation7] sm:$0xff] }
  0x16   :  { %v59_v8 = vld [vmem:[#allocation7 + $0x8] sm:$0xff] }
  0x91   :  { %v90_v9 = vpop.f32.mrf.mxu0  ;;  %v93_v10 = vpop.f32.mrf.mxu1 }
  0x92   :  { %v96_v11 = vadd.f32 %v90_v9, %v58_v7  ;;  %v97_v12 = vadd.f32 %v93_v10, %v59_v8 }
  0x94   :  { %99 = vst.msk [vmem:[#allocation7] sm:$0xff] %vm55_vm0, %v96_v11 }
  0x95   :  { %100 = vst.msk [vmem:[#allocation7 + $0x8] sm:$0xff] %vm55_vm0, %v97_v12 }
  0x96   :  { %113 = dma.vmem_to_hbm [thread:$0]  %s106_s2, 256, %s108_s27, [#allocation4], %s212_s20, %s212_s20, %s213_s21  }
  0x97   :  { %209 = dma.done.wait [#allocation4], 256  }
  0x98   :  { %210 = vsyncadd [#allocation4], 4294967040 }
  0x99   :  { %118 = vsyncpa [#allocation3], 1 }
  0x9a   :  { %119 = vsyncpa [#allocation6], 1 }
  0x9b   :  { %120 = vsyncpa [#allocation4], 1 }

</bundles_post_ra>
